<compile_context>
chip_gen: v7x
topology: tpu7x:2x2x1
jax: 0.10.0
libtpu: 0.0.40
codegen_flags: <defaults>
</compile_context>

<pallas_src>
import functools

import jax
import jax.numpy as jnp
from jax import lax
from jax.experimental import pallas as pl
from jax.experimental.pallas import tpu as pltpu


def _sigmoid_tanh(z):
    # sigmoid(z) == 0.5 * (1 + tanh(z / 2)); a single EUP op instead of exp + divide.
    return 0.5 * (1.0 + jnp.tanh(0.5 * z))


def _lml_loss_kernel(x_ref, y_ref, out_ref, *, k, tau, c_valid, b_valid, b_pad,
                     n_bisect, n_newton):
    x = x_ref[...].astype(jnp.float32)            # (B_blk, C_pad)
    y = y_ref[...]                                # (B_blk, 1) int32
    b_blk, c_pad = x.shape

    col = lax.broadcasted_iota(jnp.int32, (b_blk, c_pad), 1)

    # ---- F.normalize(x, p=2, dim=1, eps=1e-12). Padded columns are zero, so
    # they do not perturb the row norm.
    norm = jnp.sqrt(jnp.sum(x * x, axis=1, keepdims=True))
    xs = x / jnp.maximum(norm, 1e-12) / tau       # scores fed into the LML projection

    if c_valid < c_pad:
        valid = col < c_valid
        xs_max = jnp.max(jnp.where(valid, xs, -1e9), axis=1, keepdims=True)
        xs_min = jnp.min(jnp.where(valid, xs, 1e9), axis=1, keepdims=True)
        # Padded lanes -> very negative so sigmoid(xs + nu) == 0 for any bracketed nu.
        xs = jnp.where(valid, xs, -1e9)
    else:
        xs_max = jnp.max(xs, axis=1, keepdims=True)
        xs_min = jnp.min(xs, axis=1, keepdims=True)

    # Gather the label score BEFORE the projection loop; only a (B_blk,1)
    # sigmoid is needed afterwards.
    xs_y = jnp.sum(jnp.where(col == y, xs, 0.0), axis=1, keepdims=True)   # (B_blk,1)

    # ---- LML projection onto {p : 0<=p<=1, sum p = k}.
    # Solution: p = sigmoid(xs + nu) with nu the root of
    #   f(nu) = sum_j sigmoid(xs_j + nu) - k   (monotone increasing in nu).
    # Short bisection brackets the root, Newton polishes it (f' = sum s*(1-s)
    # reuses the same sigmoid values -> no extra EUP traffic).
    lo = -xs_max - 20.0                           # f(lo) < 0
    hi = -xs_min + 20.0                           # f(hi) ~ c_valid - k > 0

    def bisect_body(_, carry):
        lo_c, hi_c = carry
        mid = 0.5 * (lo_c + hi_c)
        s = _sigmoid_tanh(xs + mid)               # one vtanh per element (EUP)
        f = jnp.sum(s, axis=1, keepdims=True) - float(k)
        lo_n = jnp.where(f < 0.0, mid, lo_c)
        hi_n = jnp.where(f < 0.0, hi_c, mid)
        return lo_n, hi_n

    lo, hi = lax.fori_loop(0, n_bisect, bisect_body, (lo, hi), unroll=True)
    nu0 = 0.5 * (lo + hi)

    def newton_body(_, nu_c):
        s = _sigmoid_tanh(xs + nu_c)
        f = jnp.sum(s, axis=1, keepdims=True) - float(k)
        fp = jnp.sum(s * (1.0 - s), axis=1, keepdims=True)
        nu_n = nu_c - f / jnp.maximum(fp, 1e-12)
        return jnp.clip(nu_n, lo, hi)             # stay inside the bisection bracket

    nu = lax.fori_loop(0, n_newton, newton_body, nu0, unroll=True)

    # ---- losses = -log(p[b, y[b]] + 1e-8), per row; padded rows contribute 0.
    p_y = _sigmoid_tanh(xs_y + nu)                # (B_blk, 1), f32
    loss_rows = -jnp.log(p_y + 1e-8)
    if b_valid < b_pad:
        row = lax.broadcasted_iota(jnp.int32, (b_blk, 1), 0)
        grow = row + pl.program_id(0) * b_blk
        loss_rows = jnp.where(grow < b_valid, loss_rows, 0.0)
    out_ref[...] = loss_rows


def lml_loss(x, y, *, k=5, tau=1.0, n_bisect=12, n_newton=4):
    """Pallas TPU implementation of LMLLoss.forward(x, y)."""
    n_batch, n_classes = x.shape
    # TODO(synk): the LML degenerate branch (n_classes <= k -> p = 1 - 1e-5) is not implemented.
    assert n_classes > k, "kernel assumes n_classes > k"

    # Pad the class dim to a multiple of 128 (lanes) and the batch block to a
    # multiple of 8 (sublanes) so the (B_blk, C_pad) block sits on clean vregs.
    c_pad = ((n_classes + 127) // 128) * 128

    # Size the batch block so live (B_blk, C_pad) f32 intermediates stay well
    # under the scoped-VMEM default on every generation (v5e 16 MiB .. v7x 32 MiB).
    max_rows = max(8, (1 << 20) // (c_pad * 4))           # ~1 MiB per (B_blk, C_pad) f32 tile
    b_blk = min(((n_batch + 7) // 8) * 8, (max_rows // 8) * 8)
    b_blk = max(b_blk, 8)
    b_pad = ((n_batch + b_blk - 1) // b_blk) * b_blk
    num_blocks = b_pad // b_blk

    # Pad inputs (no dtype cast in the wrapper; the kernel casts after the DMA).
    if (b_pad, c_pad) != (n_batch, n_classes):
        x_p = jnp.zeros((b_pad, c_pad), x.dtype).at[:n_batch, :n_classes].set(x)
    else:
        x_p = x
    if b_pad != n_batch:
        y_p = jnp.zeros((b_pad, 1), jnp.int32).at[:n_batch, 0].set(y.astype(jnp.int32))
    else:
        y_p = y.reshape(n_batch, 1).astype(jnp.int32)

    n_sweeps = n_bisect + n_newton
    cost = pl.CostEstimate(
        flops=8 * b_pad * c_pad * (n_sweeps + 1),
        transcendentals=b_pad * c_pad * n_sweeps + 3 * b_pad,
        bytes_accessed=b_pad * c_pad * x_p.dtype.itemsize + b_pad * 4 + b_pad * 4,
    )

    losses = pl.pallas_call(
        functools.partial(
            _lml_loss_kernel, k=k, tau=tau, c_valid=n_classes, b_valid=n_batch,
            b_pad=b_pad, n_bisect=n_bisect, n_newton=n_newton),
        out_shape=jax.ShapeDtypeStruct((b_pad, 1), jnp.float32),
        grid=(num_blocks,),
        in_specs=[
            pl.BlockSpec((b_blk, c_pad), lambda i: (i, 0)),
            pl.BlockSpec((b_blk, 1), lambda i: (i, 0)),
        ],
        out_specs=pl.BlockSpec((b_blk, 1), lambda i: (i, 0)),
        compiler_params=pltpu.CompilerParams(dimension_semantics=("parallel",)),
        cost_estimate=cost,
    )(x_p, y_p)

    # Per-row losses (padded rows are zero); final mean in the wrapper keeps the
    # batch grid axis fully parallel (2 TCs on v7x).
    return jnp.sum(losses) / jnp.float32(n_batch)


def lml_loss_ref(x, y, *, k=5, tau=1.0, n_iter=60):
    """Pure-JAX reference (straight 60-iter bisection, exp-form sigmoid)."""
    x = x.astype(jnp.float32)
    norm = jnp.sqrt(jnp.sum(x * x, axis=1, keepdims=True))
    xs = x / jnp.maximum(norm, 1e-12) / tau
    lo = -jnp.max(xs, axis=1, keepdims=True) - 20.0
    hi = -jnp.min(xs, axis=1, keepdims=True) + 20.0
    for _ in range(n_iter):
        mid = 0.5 * (lo + hi)
        f = jnp.sum(jax.nn.sigmoid(xs + mid), axis=1, keepdims=True) - float(k)
        lo = jnp.where(f < 0.0, mid, lo)
        hi = jnp.where(f < 0.0, hi, mid)
    p = jax.nn.sigmoid(xs + 0.5 * (lo + hi))
    p_y = jnp.take_along_axis(p, y.reshape(-1, 1).astype(jnp.int32), axis=1)
    return jnp.mean(-jnp.log(p_y + 1e-8))


if __name__ == "__main__":
    B, C = 8, 128          # batch, n_classes
    K, TAU = 5, 1.0        # LMLLoss(n_classes=C, k=5, tau=1.0)

    key = jax.random.PRNGKey(0)
    kx, ky = jax.random.split(key)
    x = jax.random.normal(kx, (B, C), dtype=jnp.float32)
    y = jax.random.randint(ky, (B,), 0, C, dtype=jnp.int32)

    loss = jax.block_until_ready(lml_loss(x, y, k=K, tau=TAU))
    ref = lml_loss_ref(x, y, k=K, tau=TAU)
    assert jnp.isfinite(loss), "loss is not finite"
    assert jnp.allclose(loss, ref, rtol=1e-3, atol=1e-5), (loss, ref)

    # Ragged shapes exercise the class/batch padding paths.
    B2, C2 = 6, 200
    x2 = jax.random.normal(jax.random.PRNGKey(1), (B2, C2), dtype=jnp.float32)
    y2 = jax.random.randint(jax.random.PRNGKey(2), (B2,), 0, C2, dtype=jnp.int32)
    loss2 = jax.block_until_ready(lml_loss(x2, y2, k=K, tau=TAU))
    ref2 = lml_loss_ref(x2, y2, k=K, tau=TAU)
    assert jnp.isfinite(loss2), "ragged loss is not finite"
    assert jnp.allclose(loss2, ref2, rtol=1e-3, atol=1e-5), (loss2, ref2)

    print("KERNEL_OK")
</pallas_src>

<mosaic_0001>
module attributes {stable_mosaic.version = 11 : i64} {
  func.func @_lml_loss_kernel(%arg0: i32, %arg1: memref<8x128xf32, #tpu.memory_space<vmem>>, %arg2: memref<8x1xi32, #tpu.memory_space<vmem>>, %arg3: memref<8x1xf32, #tpu.memory_space<vmem>>) attributes {dimension_semantics = [#tpu.dimension_semantics<parallel>], iteration_bounds = array<i64: 1>, scalar_prefetch = 0 : i64, scratch_operands = 0 : i64, tpu.core_type = #tpu.core_type<tc>, window_params = [{transform_indices = @transform_0, window_bounds = array<i64: 8, 128>}, {transform_indices = @transform_1, window_bounds = array<i64: 8, 1>}, {transform_indices = @transform_2, window_bounds = array<i64: 8, 1>}]} {
    %c0 = arith.constant 0 : index
    %c0_0 = arith.constant 0 : index
    %0 = vector.load %arg1[%c0, %c0_0] : memref<8x128xf32, #tpu.memory_space<vmem>>, vector<8x128xf32>
    %c0_1 = arith.constant 0 : index
    %c0_2 = arith.constant 0 : index
    %1 = vector.load %arg2[%c0_1, %c0_2] : memref<8x1xi32, #tpu.memory_space<vmem>>, vector<8x1xi32>
    %2 = tpu.iota {dimensions = array<i32: 1>} : vector<8x128xi32>
    %3 = arith.mulf %0, %0 : vector<8x128xf32>
    %cst = arith.constant dense<0.000000e+00> : vector<8xf32>
    %4 = vector.multi_reduction <add>, %3, %cst [1] : vector<8x128xf32> to vector<8xf32>
    %5 = vector.shape_cast %4 : vector<8xf32> to vector<8x1xf32>
    %6 = math.sqrt %5 : vector<8x1xf32>
    %cst_3 = arith.constant 9.99999996E-13 : f32
    %7 = vector.broadcast %cst_3 : f32 to vector<8x1xf32>
    %8 = arith.maximumf %6, %7 : vector<8x1xf32>
    %9 = vector.broadcast %8 : vector<8x1xf32> to vector<8x128xf32>
    %10 = arith.divf %0, %9 : vector<8x128xf32>
    %cst_4 = arith.constant 1.000000e+00 : f32
    %11 = vector.broadcast %cst_4 : f32 to vector<8x128xf32>
    %12 = arith.divf %10, %11 : vector<8x128xf32>
    %cst_5 = arith.constant dense<0xFF800000> : vector<8xf32>
    %13 = vector.multi_reduction <maximumf>, %12, %cst_5 [1] : vector<8x128xf32> to vector<8xf32>
    %14 = vector.shape_cast %13 : vector<8xf32> to vector<8x1xf32>
    %cst_6 = arith.constant dense<0x7F800000> : vector<8xf32>
    %15 = vector.multi_reduction <minimumf>, %12, %cst_6 [1] : vector<8x128xf32> to vector<8xf32>
    %16 = vector.shape_cast %15 : vector<8xf32> to vector<8x1xf32>
    %17 = vector.broadcast %1 : vector<8x1xi32> to vector<8x128xi32>
    %18 = arith.cmpi eq, %2, %17 : vector<8x128xi32>
    %cst_7 = arith.constant 0.000000e+00 : f32
    %19 = vector.broadcast %cst_7 : f32 to vector<8x128xf32>
    %20 = arith.select %18, %12, %19 : vector<8x128xi1>, vector<8x128xf32>
    %cst_8 = arith.constant dense<0.000000e+00> : vector<8xf32>
    %21 = vector.multi_reduction <add>, %20, %cst_8 [1] : vector<8x128xf32> to vector<8xf32>
    %22 = vector.shape_cast %21 : vector<8xf32> to vector<8x1xf32>
    %cst_9 = arith.constant 0.000000e+00 : f32
    %23 = vector.broadcast %cst_9 : f32 to vector<8x1xf32>
    %24 = arith.subf %23, %14 : vector<8x1xf32>
    %cst_10 = arith.constant 2.000000e+01 : f32
    %25 = vector.broadcast %cst_10 : f32 to vector<8x1xf32>
    %26 = arith.subf %24, %25 : vector<8x1xf32>
    %cst_11 = arith.constant 0.000000e+00 : f32
    %27 = vector.broadcast %cst_11 : f32 to vector<8x1xf32>
    %28 = arith.subf %27, %16 : vector<8x1xf32>
    %cst_12 = arith.constant 2.000000e+01 : f32
    %29 = vector.broadcast %cst_12 : f32 to vector<8x1xf32>
    %30 = arith.addf %28, %29 : vector<8x1xf32>
    %c0_i32 = arith.constant 0 : i32
    %31 = arith.addf %26, %30 : vector<8x1xf32>
    %cst_13 = arith.constant 5.000000e-01 : f32
    %32 = vector.broadcast %cst_13 : f32 to vector<8x1xf32>
    %33 = arith.mulf %32, %31 : vector<8x1xf32>
    %34 = vector.broadcast %33 : vector<8x1xf32> to vector<8x128xf32>
    %35 = arith.addf %12, %34 : vector<8x128xf32>
    %cst_14 = arith.constant 5.000000e-01 : f32
    %36 = vector.broadcast %cst_14 : f32 to vector<8x128xf32>
    %37 = arith.mulf %36, %35 : vector<8x128xf32>
    %38 = math.tanh %37 : vector<8x128xf32>
    %cst_15 = arith.constant 1.000000e+00 : f32
    %39 = vector.broadcast %cst_15 : f32 to vector<8x128xf32>
    %40 = arith.addf %39, %38 : vector<8x128xf32>
    %cst_16 = arith.constant 5.000000e-01 : f32
    %41 = vector.broadcast %cst_16 : f32 to vector<8x128xf32>
    %42 = arith.mulf %41, %40 : vector<8x128xf32>
    %cst_17 = arith.constant dense<0.000000e+00> : vector<8xf32>
    %43 = vector.multi_reduction <add>, %42, %cst_17 [1] : vector<8x128xf32> to vector<8xf32>
    %44 = vector.shape_cast %43 : vector<8xf32> to vector<8x1xf32>
    %cst_18 = arith.constant 5.000000e+00 : f32
    %45 = vector.broadcast %cst_18 : f32 to vector<8x1xf32>
    %46 = arith.subf %44, %45 : vector<8x1xf32>
    %cst_19 = arith.constant 0.000000e+00 : f32
    %47 = vector.broadcast %cst_19 : f32 to vector<8x1xf32>
    %48 = arith.cmpf olt, %46, %47 : vector<8x1xf32>
    %49 = arith.select %48, %33, %26 : vector<8x1xi1>, vector<8x1xf32>
    %cst_20 = arith.constant 0.000000e+00 : f32
    %50 = vector.broadcast %cst_20 : f32 to vector<8x1xf32>
    %51 = arith.cmpf olt, %46, %50 : vector<8x1xf32>
    %52 = arith.select %51, %30, %33 : vector<8x1xi1>, vector<8x1xf32>
    %c1_i32 = arith.constant 1 : i32
    %53 = arith.addf %49, %52 : vector<8x1xf32>
    %cst_21 = arith.constant 5.000000e-01 : f32
    %54 = vector.broadcast %cst_21 : f32 to vector<8x1xf32>
    %55 = arith.mulf %54, %53 : vector<8x1xf32>
    %56 = vector.broadcast %55 : vector<8x1xf32> to vector<8x128xf32>
    %57 = arith.addf %12, %56 : vector<8x128xf32>
    %cst_22 = arith.constant 5.000000e-01 : f32
    %58 = vector.broadcast %cst_22 : f32 to vector<8x128xf32>
    %59 = arith.mulf %58, %57 : vector<8x128xf32>
    %60 = math.tanh %59 : vector<8x128xf32>
    %cst_23 = arith.constant 1.000000e+00 : f32
    %61 = vector.broadcast %cst_23 : f32 to vector<8x128xf32>
    %62 = arith.addf %61, %60 : vector<8x128xf32>
    %cst_24 = arith.constant 5.000000e-01 : f32
    %63 = vector.broadcast %cst_24 : f32 to vector<8x128xf32>
    %64 = arith.mulf %63, %62 : vector<8x128xf32>
    %cst_25 = arith.constant dense<0.000000e+00> : vector<8xf32>
    %65 = vector.multi_reduction <add>, %64, %cst_25 [1] : vector<8x128xf32> to vector<8xf32>
    %66 = vector.shape_cast %65 : vector<8xf32> to vector<8x1xf32>
    %cst_26 = arith.constant 5.000000e+00 : f32
    %67 = vector.broadcast %cst_26 : f32 to vector<8x1xf32>
    %68 = arith.subf %66, %67 : vector<8x1xf32>
    %cst_27 = arith.constant 0.000000e+00 : f32
    %69 = vector.broadcast %cst_27 : f32 to vector<8x1xf32>
    %70 = arith.cmpf olt, %68, %69 : vector<8x1xf32>
    %71 = arith.select %70, %55, %49 : vector<8x1xi1>, vector<8x1xf32>
    %cst_28 = arith.constant 0.000000e+00 : f32
    %72 = vector.broadcast %cst_28 : f32 to vector<8x1xf32>
    %73 = arith.cmpf olt, %68, %72 : vector<8x1xf32>
    %74 = arith.select %73, %52, %55 : vector<8x1xi1>, vector<8x1xf32>
    %c2_i32 = arith.constant 2 : i32
    %75 = arith.addf %71, %74 : vector<8x1xf32>
    %cst_29 = arith.constant 5.000000e-01 : f32
    %76 = vector.broadcast %cst_29 : f32 to vector<8x1xf32>
    %77 = arith.mulf %76, %75 : vector<8x1xf32>
    %78 = vector.broadcast %77 : vector<8x1xf32> to vector<8x128xf32>
    %79 = arith.addf %12, %78 : vector<8x128xf32>
    %cst_30 = arith.constant 5.000000e-01 : f32
    %80 = vector.broadcast %cst_30 : f32 to vector<8x128xf32>
    %81 = arith.mulf %80, %79 : vector<8x128xf32>
    %82 = math.tanh %81 : vector<8x128xf32>
    %cst_31 = arith.constant 1.000000e+00 : f32
    %83 = vector.broadcast %cst_31 : f32 to vector<8x128xf32>
    %84 = arith.addf %83, %82 : vector<8x128xf32>
    %cst_32 = arith.constant 5.000000e-01 : f32
    %85 = vector.broadcast %cst_32 : f32 to vector<8x128xf32>
    %86 = arith.mulf %85, %84 : vector<8x128xf32>
    %cst_33 = arith.constant dense<0.000000e+00> : vector<8xf32>
    %87 = vector.multi_reduction <add>, %86, %cst_33 [1] : vector<8x128xf32> to vector<8xf32>
    %88 = vector.shape_cast %87 : vector<8xf32> to vector<8x1xf32>
    %cst_34 = arith.constant 5.000000e+00 : f32
    %89 = vector.broadcast %cst_34 : f32 to vector<8x1xf32>
    %90 = arith.subf %88, %89 : vector<8x1xf32>
    %cst_35 = arith.constant 0.000000e+00 : f32
    %91 = vector.broadcast %cst_35 : f32 to vector<8x1xf32>
    %92 = arith.cmpf olt, %90, %91 : vector<8x1xf32>
    %93 = arith.select %92, %77, %71 : vector<8x1xi1>, vector<8x1xf32>
    %cst_36 = arith.constant 0.000000e+00 : f32
    %94 = vector.broadcast %cst_36 : f32 to vector<8x1xf32>
    %95 = arith.cmpf olt, %90, %94 : vector<8x1xf32>
    %96 = arith.select %95, %74, %77 : vector<8x1xi1>, vector<8x1xf32>
    %c3_i32 = arith.constant 3 : i32
    %97 = arith.addf %93, %96 : vector<8x1xf32>
    %cst_37 = arith.constant 5.000000e-01 : f32
    %98 = vector.broadcast %cst_37 : f32 to vector<8x1xf32>
    %99 = arith.mulf %98, %97 : vector<8x1xf32>
    %100 = vector.broadcast %99 : vector<8x1xf32> to vector<8x128xf32>
    %101 = arith.addf %12, %100 : vector<8x128xf32>
    %cst_38 = arith.constant 5.000000e-01 : f32
    %102 = vector.broadcast %cst_38 : f32 to vector<8x128xf32>
    %103 = arith.mulf %102, %101 : vector<8x128xf32>
    %104 = math.tanh %103 : vector<8x128xf32>
    %cst_39 = arith.constant 1.000000e+00 : f32
    %105 = vector.broadcast %cst_39 : f32 to vector<8x128xf32>
    %106 = arith.addf %105, %104 : vector<8x128xf32>
    %cst_40 = arith.constant 5.000000e-01 : f32
    %107 = vector.broadcast %cst_40 : f32 to vector<8x128xf32>
    %108 = arith.mulf %107, %106 : vector<8x128xf32>
    %cst_41 = arith.constant dense<0.000000e+00> : vector<8xf32>
    %109 = vector.multi_reduction <add>, %108, %cst_41 [1] : vector<8x128xf32> to vector<8xf32>
    %110 = vector.shape_cast %109 : vector<8xf32> to vector<8x1xf32>
    %cst_42 = arith.constant 5.000000e+00 : f32
    %111 = vector.broadcast %cst_42 : f32 to vector<8x1xf32>
    %112 = arith.subf %110, %111 : vector<8x1xf32>
    %cst_43 = arith.constant 0.000000e+00 : f32
    %113 = vector.broadcast %cst_43 : f32 to vector<8x1xf32>
    %114 = arith.cmpf olt, %112, %113 : vector<8x1xf32>
    %115 = arith.select %114, %99, %93 : vector<8x1xi1>, vector<8x1xf32>
    %cst_44 = arith.constant 0.000000e+00 : f32
    %116 = vector.broadcast %cst_44 : f32 to vector<8x1xf32>
    %117 = arith.cmpf olt, %112, %116 : vector<8x1xf32>
    %118 = arith.select %117, %96, %99 : vector<8x1xi1>, vector<8x1xf32>
    %c4_i32 = arith.constant 4 : i32
    %119 = arith.addf %115, %118 : vector<8x1xf32>
    %cst_45 = arith.constant 5.000000e-01 : f32
    %120 = vector.broadcast %cst_45 : f32 to vector<8x1xf32>
    %121 = arith.mulf %120, %119 : vector<8x1xf32>
    %122 = vector.broadcast %121 : vector<8x1xf32> to vector<8x128xf32>
    %123 = arith.addf %12, %122 : vector<8x128xf32>
    %cst_46 = arith.constant 5.000000e-01 : f32
    %124 = vector.broadcast %cst_46 : f32 to vector<8x128xf32>
    %125 = arith.mulf %124, %123 : vector<8x128xf32>
    %126 = math.tanh %125 : vector<8x128xf32>
    %cst_47 = arith.constant 1.000000e+00 : f32
    %127 = vector.broadcast %cst_47 : f32 to vector<8x128xf32>
    %128 = arith.addf %127, %126 : vector<8x128xf32>
    %cst_48 = arith.constant 5.000000e-01 : f32
    %129 = vector.broadcast %cst_48 : f32 to vector<8x128xf32>
    %130 = arith.mulf %129, %128 : vector<8x128xf32>
    %cst_49 = arith.constant dense<0.000000e+00> : vector<8xf32>
    %131 = vector.multi_reduction <add>, %130, %cst_49 [1] : vector<8x128xf32> to vector<8xf32>
    %132 = vector.shape_cast %131 : vector<8xf32> to vector<8x1xf32>
    %cst_50 = arith.constant 5.000000e+00 : f32
    %133 = vector.broadcast %cst_50 : f32 to vector<8x1xf32>
    %134 = arith.subf %132, %133 : vector<8x1xf32>
    %cst_51 = arith.constant 0.000000e+00 : f32
    %135 = vector.broadcast %cst_51 : f32 to vector<8x1xf32>
    %136 = arith.cmpf olt, %134, %135 : vector<8x1xf32>
    %137 = arith.select %136, %121, %115 : vector<8x1xi1>, vector<8x1xf32>
    %cst_52 = arith.constant 0.000000e+00 : f32
    %138 = vector.broadcast %cst_52 : f32 to vector<8x1xf32>
    %139 = arith.cmpf olt, %134, %138 : vector<8x1xf32>
    %140 = arith.select %139, %118, %121 : vector<8x1xi1>, vector<8x1xf32>
    %c5_i32 = arith.constant 5 : i32
    %141 = arith.addf %137, %140 : vector<8x1xf32>
    %cst_53 = arith.constant 5.000000e-01 : f32
    %142 = vector.broadcast %cst_53 : f32 to vector<8x1xf32>
    %143 = arith.mulf %142, %141 : vector<8x1xf32>
    %144 = vector.broadcast %143 : vector<8x1xf32> to vector<8x128xf32>
    %145 = arith.addf %12, %144 : vector<8x128xf32>
    %cst_54 = arith.constant 5.000000e-01 : f32
    %146 = vector.broadcast %cst_54 : f32 to vector<8x128xf32>
    %147 = arith.mulf %146, %145 : vector<8x128xf32>
    %148 = math.tanh %147 : vector<8x128xf32>
    %cst_55 = arith.constant 1.000000e+00 : f32
    %149 = vector.broadcast %cst_55 : f32 to vector<8x128xf32>
    %150 = arith.addf %149, %148 : vector<8x128xf32>
    %cst_56 = arith.constant 5.000000e-01 : f32
    %151 = vector.broadcast %cst_56 : f32 to vector<8x128xf32>
    %152 = arith.mulf %151, %150 : vector<8x128xf32>
    %cst_57 = arith.constant dense<0.000000e+00> : vector<8xf32>
    %153 = vector.multi_reduction <add>, %152, %cst_57 [1] : vector<8x128xf32> to vector<8xf32>
    %154 = vector.shape_cast %153 : vector<8xf32> to vector<8x1xf32>
    %cst_58 = arith.constant 5.000000e+00 : f32
    %155 = vector.broadcast %cst_58 : f32 to vector<8x1xf32>
    %156 = arith.subf %154, %155 : vector<8x1xf32>
    %cst_59 = arith.constant 0.000000e+00 : f32
    %157 = vector.broadcast %cst_59 : f32 to vector<8x1xf32>
    %158 = arith.cmpf olt, %156, %157 : vector<8x1xf32>
    %159 = arith.select %158, %143, %137 : vector<8x1xi1>, vector<8x1xf32>
    %cst_60 = arith.constant 0.000000e+00 : f32
    %160 = vector.broadcast %cst_60 : f32 to vector<8x1xf32>
    %161 = arith.cmpf olt, %156, %160 : vector<8x1xf32>
    %162 = arith.select %161, %140, %143 : vector<8x1xi1>, vector<8x1xf32>
    %c6_i32 = arith.constant 6 : i32
    %163 = arith.addf %159, %162 : vector<8x1xf32>
    %cst_61 = arith.constant 5.000000e-01 : f32
    %164 = vector.broadcast %cst_61 : f32 to vector<8x1xf32>
    %165 = arith.mulf %164, %163 : vector<8x1xf32>
    %166 = vector.broadcast %165 : vector<8x1xf32> to vector<8x128xf32>
    %167 = arith.addf %12, %166 : vector<8x128xf32>
    %cst_62 = arith.constant 5.000000e-01 : f32
    %168 = vector.broadcast %cst_62 : f32 to vector<8x128xf32>
    %169 = arith.mulf %168, %167 : vector<8x128xf32>
    %170 = math.tanh %169 : vector<8x128xf32>
    %cst_63 = arith.constant 1.000000e+00 : f32
    %171 = vector.broadcast %cst_63 : f32 to vector<8x128xf32>
    %172 = arith.addf %171, %170 : vector<8x128xf32>
    %cst_64 = arith.constant 5.000000e-01 : f32
    %173 = vector.broadcast %cst_64 : f32 to vector<8x128xf32>
    %174 = arith.mulf %173, %172 : vector<8x128xf32>
    %cst_65 = arith.constant dense<0.000000e+00> : vector<8xf32>
    %175 = vector.multi_reduction <add>, %174, %cst_65 [1] : vector<8x128xf32> to vector<8xf32>
    %176 = vector.shape_cast %175 : vector<8xf32> to vector<8x1xf32>
    %cst_66 = arith.constant 5.000000e+00 : f32
    %177 = vector.broadcast %cst_66 : f32 to vector<8x1xf32>
    %178 = arith.subf %176, %177 : vector<8x1xf32>
    %cst_67 = arith.constant 0.000000e+00 : f32
    %179 = vector.broadcast %cst_67 : f32 to vector<8x1xf32>
    %180 = arith.cmpf olt, %178, %179 : vector<8x1xf32>
    %181 = arith.select %180, %165, %159 : vector<8x1xi1>, vector<8x1xf32>
    %cst_68 = arith.constant 0.000000e+00 : f32
    %182 = vector.broadcast %cst_68 : f32 to vector<8x1xf32>
    %183 = arith.cmpf olt, %178, %182 : vector<8x1xf32>
    %184 = arith.select %183, %162, %165 : vector<8x1xi1>, vector<8x1xf32>
    %c7_i32 = arith.constant 7 : i32
    %185 = arith.addf %181, %184 : vector<8x1xf32>
    %cst_69 = arith.constant 5.000000e-01 : f32
    %186 = vector.broadcast %cst_69 : f32 to vector<8x1xf32>
    %187 = arith.mulf %186, %185 : vector<8x1xf32>
    %188 = vector.broadcast %187 : vector<8x1xf32> to vector<8x128xf32>
    %189 = arith.addf %12, %188 : vector<8x128xf32>
    %cst_70 = arith.constant 5.000000e-01 : f32
    %190 = vector.broadcast %cst_70 : f32 to vector<8x128xf32>
    %191 = arith.mulf %190, %189 : vector<8x128xf32>
    %192 = math.tanh %191 : vector<8x128xf32>
    %cst_71 = arith.constant 1.000000e+00 : f32
    %193 = vector.broadcast %cst_71 : f32 to vector<8x128xf32>
    %194 = arith.addf %193, %192 : vector<8x128xf32>
    %cst_72 = arith.constant 5.000000e-01 : f32
    %195 = vector.broadcast %cst_72 : f32 to vector<8x128xf32>
    %196 = arith.mulf %195, %194 : vector<8x128xf32>
    %cst_73 = arith.constant dense<0.000000e+00> : vector<8xf32>
    %197 = vector.multi_reduction <add>, %196, %cst_73 [1] : vector<8x128xf32> to vector<8xf32>
    %198 = vector.shape_cast %197 : vector<8xf32> to vector<8x1xf32>
    %cst_74 = arith.constant 5.000000e+00 : f32
    %199 = vector.broadcast %cst_74 : f32 to vector<8x1xf32>
    %200 = arith.subf %198, %199 : vector<8x1xf32>
    %cst_75 = arith.constant 0.000000e+00 : f32
    %201 = vector.broadcast %cst_75 : f32 to vector<8x1xf32>
    %202 = arith.cmpf olt, %200, %201 : vector<8x1xf32>
    %203 = arith.select %202, %187, %181 : vector<8x1xi1>, vector<8x1xf32>
    %cst_76 = arith.constant 0.000000e+00 : f32
    %204 = vector.broadcast %cst_76 : f32 to vector<8x1xf32>
    %205 = arith.cmpf olt, %200, %204 : vector<8x1xf32>
    %206 = arith.select %205, %184, %187 : vector<8x1xi1>, vector<8x1xf32>
    %c8_i32 = arith.constant 8 : i32
    %207 = arith.addf %203, %206 : vector<8x1xf32>
    %cst_77 = arith.constant 5.000000e-01 : f32
    %208 = vector.broadcast %cst_77 : f32 to vector<8x1xf32>
    %209 = arith.mulf %208, %207 : vector<8x1xf32>
    %210 = vector.broadcast %209 : vector<8x1xf32> to vector<8x128xf32>
    %211 = arith.addf %12, %210 : vector<8x128xf32>
    %cst_78 = arith.constant 5.000000e-01 : f32
    %212 = vector.broadcast %cst_78 : f32 to vector<8x128xf32>
    %213 = arith.mulf %212, %211 : vector<8x128xf32>
    %214 = math.tanh %213 : vector<8x128xf32>
    %cst_79 = arith.constant 1.000000e+00 : f32
    %215 = vector.broadcast %cst_79 : f32 to vector<8x128xf32>
    %216 = arith.addf %215, %214 : vector<8x128xf32>
    %cst_80 = arith.constant 5.000000e-01 : f32
    %217 = vector.broadcast %cst_80 : f32 to vector<8x128xf32>
    %218 = arith.mulf %217, %216 : vector<8x128xf32>
    %cst_81 = arith.constant dense<0.000000e+00> : vector<8xf32>
    %219 = vector.multi_reduction <add>, %218, %cst_81 [1] : vector<8x128xf32> to vector<8xf32>
    %220 = vector.shape_cast %219 : vector<8xf32> to vector<8x1xf32>
    %cst_82 = arith.constant 5.000000e+00 : f32
    %221 = vector.broadcast %cst_82 : f32 to vector<8x1xf32>
    %222 = arith.subf %220, %221 : vector<8x1xf32>
    %cst_83 = arith.constant 0.000000e+00 : f32
    %223 = vector.broadcast %cst_83 : f32 to vector<8x1xf32>
    %224 = arith.cmpf olt, %222, %223 : vector<8x1xf32>
    %225 = arith.select %224, %209, %203 : vector<8x1xi1>, vector<8x1xf32>
    %cst_84 = arith.constant 0.000000e+00 : f32
    %226 = vector.broadcast %cst_84 : f32 to vector<8x1xf32>
    %227 = arith.cmpf olt, %222, %226 : vector<8x1xf32>
    %228 = arith.select %227, %206, %209 : vector<8x1xi1>, vector<8x1xf32>
    %c9_i32 = arith.constant 9 : i32
    %229 = arith.addf %225, %228 : vector<8x1xf32>
    %cst_85 = arith.constant 5.000000e-01 : f32
    %230 = vector.broadcast %cst_85 : f32 to vector<8x1xf32>
    %231 = arith.mulf %230, %229 : vector<8x1xf32>
    %232 = vector.broadcast %231 : vector<8x1xf32> to vector<8x128xf32>
    %233 = arith.addf %12, %232 : vector<8x128xf32>
    %cst_86 = arith.constant 5.000000e-01 : f32
    %234 = vector.broadcast %cst_86 : f32 to vector<8x128xf32>
    %235 = arith.mulf %234, %233 : vector<8x128xf32>
    %236 = math.tanh %235 : vector<8x128xf32>
    %cst_87 = arith.constant 1.000000e+00 : f32
    %237 = vector.broadcast %cst_87 : f32 to vector<8x128xf32>
    %238 = arith.addf %237, %236 : vector<8x128xf32>
    %cst_88 = arith.constant 5.000000e-01 : f32
    %239 = vector.broadcast %cst_88 : f32 to vector<8x128xf32>
    %240 = arith.mulf %239, %238 : vector<8x128xf32>
    %cst_89 = arith.constant dense<0.000000e+00> : vector<8xf32>
    %241 = vector.multi_reduction <add>, %240, %cst_89 [1] : vector<8x128xf32> to vector<8xf32>
    %242 = vector.shape_cast %241 : vector<8xf32> to vector<8x1xf32>
    %cst_90 = arith.constant 5.000000e+00 : f32
    %243 = vector.broadcast %cst_90 : f32 to vector<8x1xf32>
    %244 = arith.subf %242, %243 : vector<8x1xf32>
    %cst_91 = arith.constant 0.000000e+00 : f32
    %245 = vector.broadcast %cst_91 : f32 to vector<8x1xf32>
    %246 = arith.cmpf olt, %244, %245 : vector<8x1xf32>
    %247 = arith.select %246, %231, %225 : vector<8x1xi1>, vector<8x1xf32>
    %cst_92 = arith.constant 0.000000e+00 : f32
    %248 = vector.broadcast %cst_92 : f32 to vector<8x1xf32>
    %249 = arith.cmpf olt, %244, %248 : vector<8x1xf32>
    %250 = arith.select %249, %228, %231 : vector<8x1xi1>, vector<8x1xf32>
    %c10_i32 = arith.constant 10 : i32
    %251 = arith.addf %247, %250 : vector<8x1xf32>
    %cst_93 = arith.constant 5.000000e-01 : f32
    %252 = vector.broadcast %cst_93 : f32 to vector<8x1xf32>
    %253 = arith.mulf %252, %251 : vector<8x1xf32>
    %254 = vector.broadcast %253 : vector<8x1xf32> to vector<8x128xf32>
    %255 = arith.addf %12, %254 : vector<8x128xf32>
    %cst_94 = arith.constant 5.000000e-01 : f32
    %256 = vector.broadcast %cst_94 : f32 to vector<8x128xf32>
    %257 = arith.mulf %256, %255 : vector<8x128xf32>
    %258 = math.tanh %257 : vector<8x128xf32>
    %cst_95 = arith.constant 1.000000e+00 : f32
    %259 = vector.broadcast %cst_95 : f32 to vector<8x128xf32>
    %260 = arith.addf %259, %258 : vector<8x128xf32>
    %cst_96 = arith.constant 5.000000e-01 : f32
    %261 = vector.broadcast %cst_96 : f32 to vector<8x128xf32>
    %262 = arith.mulf %261, %260 : vector<8x128xf32>
    %cst_97 = arith.constant dense<0.000000e+00> : vector<8xf32>
    %263 = vector.multi_reduction <add>, %262, %cst_97 [1] : vector<8x128xf32> to vector<8xf32>
    %264 = vector.shape_cast %263 : vector<8xf32> to vector<8x1xf32>
    %cst_98 = arith.constant 5.000000e+00 : f32
    %265 = vector.broadcast %cst_98 : f32 to vector<8x1xf32>
    %266 = arith.subf %264, %265 : vector<8x1xf32>
    %cst_99 = arith.constant 0.000000e+00 : f32
    %267 = vector.broadcast %cst_99 : f32 to vector<8x1xf32>
    %268 = arith.cmpf olt, %266, %267 : vector<8x1xf32>
    %269 = arith.select %268, %253, %247 : vector<8x1xi1>, vector<8x1xf32>
    %cst_100 = arith.constant 0.000000e+00 : f32
    %270 = vector.broadcast %cst_100 : f32 to vector<8x1xf32>
    %271 = arith.cmpf olt, %266, %270 : vector<8x1xf32>
    %272 = arith.select %271, %250, %253 : vector<8x1xi1>, vector<8x1xf32>
    %c11_i32 = arith.constant 11 : i32
    %273 = arith.addf %269, %272 : vector<8x1xf32>
    %cst_101 = arith.constant 5.000000e-01 : f32
    %274 = vector.broadcast %cst_101 : f32 to vector<8x1xf32>
    %275 = arith.mulf %274, %273 : vector<8x1xf32>
    %276 = vector.broadcast %275 : vector<8x1xf32> to vector<8x128xf32>
    %277 = arith.addf %12, %276 : vector<8x128xf32>
    %cst_102 = arith.constant 5.000000e-01 : f32
    %278 = vector.broadcast %cst_102 : f32 to vector<8x128xf32>
    %279 = arith.mulf %278, %277 : vector<8x128xf32>
    %280 = math.tanh %279 : vector<8x128xf32>
    %cst_103 = arith.constant 1.000000e+00 : f32
    %281 = vector.broadcast %cst_103 : f32 to vector<8x128xf32>
    %282 = arith.addf %281, %280 : vector<8x128xf32>
    %cst_104 = arith.constant 5.000000e-01 : f32
    %283 = vector.broadcast %cst_104 : f32 to vector<8x128xf32>
    %284 = arith.mulf %283, %282 : vector<8x128xf32>
    %cst_105 = arith.constant dense<0.000000e+00> : vector<8xf32>
    %285 = vector.multi_reduction <add>, %284, %cst_105 [1] : vector<8x128xf32> to vector<8xf32>
    %286 = vector.shape_cast %285 : vector<8xf32> to vector<8x1xf32>
    %cst_106 = arith.constant 5.000000e+00 : f32
    %287 = vector.broadcast %cst_106 : f32 to vector<8x1xf32>
    %288 = arith.subf %286, %287 : vector<8x1xf32>
    %cst_107 = arith.constant 0.000000e+00 : f32
    %289 = vector.broadcast %cst_107 : f32 to vector<8x1xf32>
    %290 = arith.cmpf olt, %288, %289 : vector<8x1xf32>
    %291 = arith.select %290, %275, %269 : vector<8x1xi1>, vector<8x1xf32>
    %cst_108 = arith.constant 0.000000e+00 : f32
    %292 = vector.broadcast %cst_108 : f32 to vector<8x1xf32>
    %293 = arith.cmpf olt, %288, %292 : vector<8x1xf32>
    %294 = arith.select %293, %272, %275 : vector<8x1xi1>, vector<8x1xf32>
    %295 = arith.addf %291, %294 : vector<8x1xf32>
    %cst_109 = arith.constant 5.000000e-01 : f32
    %296 = vector.broadcast %cst_109 : f32 to vector<8x1xf32>
    %297 = arith.mulf %296, %295 : vector<8x1xf32>
    %c0_i32_110 = arith.constant 0 : i32
    %298 = vector.broadcast %297 : vector<8x1xf32> to vector<8x128xf32>
    %299 = arith.addf %12, %298 : vector<8x128xf32>
    %cst_111 = arith.constant 5.000000e-01 : f32
    %300 = vector.broadcast %cst_111 : f32 to vector<8x128xf32>
    %301 = arith.mulf %300, %299 : vector<8x128xf32>
    %302 = math.tanh %301 : vector<8x128xf32>
    %cst_112 = arith.constant 1.000000e+00 : f32
    %303 = vector.broadcast %cst_112 : f32 to vector<8x128xf32>
    %304 = arith.addf %303, %302 : vector<8x128xf32>
    %cst_113 = arith.constant 5.000000e-01 : f32
    %305 = vector.broadcast %cst_113 : f32 to vector<8x128xf32>
    %306 = arith.mulf %305, %304 : vector<8x128xf32>
    %cst_114 = arith.constant dense<0.000000e+00> : vector<8xf32>
    %307 = vector.multi_reduction <add>, %306, %cst_114 [1] : vector<8x128xf32> to vector<8xf32>
    %308 = vector.shape_cast %307 : vector<8xf32> to vector<8x1xf32>
    %cst_115 = arith.constant 5.000000e+00 : f32
    %309 = vector.broadcast %cst_115 : f32 to vector<8x1xf32>
    %310 = arith.subf %308, %309 : vector<8x1xf32>
    %cst_116 = arith.constant 1.000000e+00 : f32
    %311 = vector.broadcast %cst_116 : f32 to vector<8x128xf32>
    %312 = arith.subf %311, %306 : vector<8x128xf32>
    %313 = arith.mulf %306, %312 : vector<8x128xf32>
    %cst_117 = arith.constant dense<0.000000e+00> : vector<8xf32>
    %314 = vector.multi_reduction <add>, %313, %cst_117 [1] : vector<8x128xf32> to vector<8xf32>
    %315 = vector.shape_cast %314 : vector<8xf32> to vector<8x1xf32>
    %cst_118 = arith.constant 9.99999996E-13 : f32
    %316 = vector.broadcast %cst_118 : f32 to vector<8x1xf32>
    %317 = arith.maximumf %315, %316 : vector<8x1xf32>
    %318 = arith.divf %310, %317 : vector<8x1xf32>
    %319 = arith.subf %297, %318 : vector<8x1xf32>
    %320 = arith.maximumf %291, %319 : vector<8x1xf32>
    %321 = arith.minimumf %294, %320 : vector<8x1xf32>
    %c1_i32_119 = arith.constant 1 : i32
    %322 = vector.broadcast %321 : vector<8x1xf32> to vector<8x128xf32>
    %323 = arith.addf %12, %322 : vector<8x128xf32>
    %cst_120 = arith.constant 5.000000e-01 : f32
    %324 = vector.broadcast %cst_120 : f32 to vector<8x128xf32>
    %325 = arith.mulf %324, %323 : vector<8x128xf32>
    %326 = math.tanh %325 : vector<8x128xf32>
    %cst_121 = arith.constant 1.000000e+00 : f32
    %327 = vector.broadcast %cst_121 : f32 to vector<8x128xf32>
    %328 = arith.addf %327, %326 : vector<8x128xf32>
    %cst_122 = arith.constant 5.000000e-01 : f32
    %329 = vector.broadcast %cst_122 : f32 to vector<8x128xf32>
    %330 = arith.mulf %329, %328 : vector<8x128xf32>
    %cst_123 = arith.constant dense<0.000000e+00> : vector<8xf32>
    %331 = vector.multi_reduction <add>, %330, %cst_123 [1] : vector<8x128xf32> to vector<8xf32>
    %332 = vector.shape_cast %331 : vector<8xf32> to vector<8x1xf32>
    %cst_124 = arith.constant 5.000000e+00 : f32
    %333 = vector.broadcast %cst_124 : f32 to vector<8x1xf32>
    %334 = arith.subf %332, %333 : vector<8x1xf32>
    %cst_125 = arith.constant 1.000000e+00 : f32
    %335 = vector.broadcast %cst_125 : f32 to vector<8x128xf32>
    %336 = arith.subf %335, %330 : vector<8x128xf32>
    %337 = arith.mulf %330, %336 : vector<8x128xf32>
    %cst_126 = arith.constant dense<0.000000e+00> : vector<8xf32>
    %338 = vector.multi_reduction <add>, %337, %cst_126 [1] : vector<8x128xf32> to vector<8xf32>
    %339 = vector.shape_cast %338 : vector<8xf32> to vector<8x1xf32>
    %cst_127 = arith.constant 9.99999996E-13 : f32
    %340 = vector.broadcast %cst_127 : f32 to vector<8x1xf32>
    %341 = arith.maximumf %339, %340 : vector<8x1xf32>
    %342 = arith.divf %334, %341 : vector<8x1xf32>
    %343 = arith.subf %321, %342 : vector<8x1xf32>
    %344 = arith.maximumf %291, %343 : vector<8x1xf32>
    %345 = arith.minimumf %294, %344 : vector<8x1xf32>
    %c2_i32_128 = arith.constant 2 : i32
    %346 = vector.broadcast %345 : vector<8x1xf32> to vector<8x128xf32>
    %347 = arith.addf %12, %346 : vector<8x128xf32>
    %cst_129 = arith.constant 5.000000e-01 : f32
    %348 = vector.broadcast %cst_129 : f32 to vector<8x128xf32>
    %349 = arith.mulf %348, %347 : vector<8x128xf32>
    %350 = math.tanh %349 : vector<8x128xf32>
    %cst_130 = arith.constant 1.000000e+00 : f32
    %351 = vector.broadcast %cst_130 : f32 to vector<8x128xf32>
    %352 = arith.addf %351, %350 : vector<8x128xf32>
    %cst_131 = arith.constant 5.000000e-01 : f32
    %353 = vector.broadcast %cst_131 : f32 to vector<8x128xf32>
    %354 = arith.mulf %353, %352 : vector<8x128xf32>
    %cst_132 = arith.constant dense<0.000000e+00> : vector<8xf32>
    %355 = vector.multi_reduction <add>, %354, %cst_132 [1] : vector<8x128xf32> to vector<8xf32>
    %356 = vector.shape_cast %355 : vector<8xf32> to vector<8x1xf32>
    %cst_133 = arith.constant 5.000000e+00 : f32
    %357 = vector.broadcast %cst_133 : f32 to vector<8x1xf32>
    %358 = arith.subf %356, %357 : vector<8x1xf32>
    %cst_134 = arith.constant 1.000000e+00 : f32
    %359 = vector.broadcast %cst_134 : f32 to vector<8x128xf32>
    %360 = arith.subf %359, %354 : vector<8x128xf32>
    %361 = arith.mulf %354, %360 : vector<8x128xf32>
    %cst_135 = arith.constant dense<0.000000e+00> : vector<8xf32>
    %362 = vector.multi_reduction <add>, %361, %cst_135 [1] : vector<8x128xf32> to vector<8xf32>
    %363 = vector.shape_cast %362 : vector<8xf32> to vector<8x1xf32>
    %cst_136 = arith.constant 9.99999996E-13 : f32
    %364 = vector.broadcast %cst_136 : f32 to vector<8x1xf32>
    %365 = arith.maximumf %363, %364 : vector<8x1xf32>
    %366 = arith.divf %358, %365 : vector<8x1xf32>
    %367 = arith.subf %345, %366 : vector<8x1xf32>
    %368 = arith.maximumf %291, %367 : vector<8x1xf32>
    %369 = arith.minimumf %294, %368 : vector<8x1xf32>
    %c3_i32_137 = arith.constant 3 : i32
    %370 = vector.broadcast %369 : vector<8x1xf32> to vector<8x128xf32>
    %371 = arith.addf %12, %370 : vector<8x128xf32>
    %cst_138 = arith.constant 5.000000e-01 : f32
    %372 = vector.broadcast %cst_138 : f32 to vector<8x128xf32>
    %373 = arith.mulf %372, %371 : vector<8x128xf32>
    %374 = math.tanh %373 : vector<8x128xf32>
    %cst_139 = arith.constant 1.000000e+00 : f32
    %375 = vector.broadcast %cst_139 : f32 to vector<8x128xf32>
    %376 = arith.addf %375, %374 : vector<8x128xf32>
    %cst_140 = arith.constant 5.000000e-01 : f32
    %377 = vector.broadcast %cst_140 : f32 to vector<8x128xf32>
    %378 = arith.mulf %377, %376 : vector<8x128xf32>
    %cst_141 = arith.constant dense<0.000000e+00> : vector<8xf32>
    %379 = vector.multi_reduction <add>, %378, %cst_141 [1] : vector<8x128xf32> to vector<8xf32>
    %380 = vector.shape_cast %379 : vector<8xf32> to vector<8x1xf32>
    %cst_142 = arith.constant 5.000000e+00 : f32
    %381 = vector.broadcast %cst_142 : f32 to vector<8x1xf32>
    %382 = arith.subf %380, %381 : vector<8x1xf32>
    %cst_143 = arith.constant 1.000000e+00 : f32
    %383 = vector.broadcast %cst_143 : f32 to vector<8x128xf32>
    %384 = arith.subf %383, %378 : vector<8x128xf32>
    %385 = arith.mulf %378, %384 : vector<8x128xf32>
    %cst_144 = arith.constant dense<0.000000e+00> : vector<8xf32>
    %386 = vector.multi_reduction <add>, %385, %cst_144 [1] : vector<8x128xf32> to vector<8xf32>
    %387 = vector.shape_cast %386 : vector<8xf32> to vector<8x1xf32>
    %cst_145 = arith.constant 9.99999996E-13 : f32
    %388 = vector.broadcast %cst_145 : f32 to vector<8x1xf32>
    %389 = arith.maximumf %387, %388 : vector<8x1xf32>
    %390 = arith.divf %382, %389 : vector<8x1xf32>
    %391 = arith.subf %369, %390 : vector<8x1xf32>
    %392 = arith.maximumf %291, %391 : vector<8x1xf32>
    %393 = arith.minimumf %294, %392 : vector<8x1xf32>
    %394 = arith.addf %22, %393 : vector<8x1xf32>
    %cst_146 = arith.constant 5.000000e-01 : f32
    %395 = vector.broadcast %cst_146 : f32 to vector<8x1xf32>
    %396 = arith.mulf %395, %394 : vector<8x1xf32>
    %397 = math.tanh %396 : vector<8x1xf32>
    %cst_147 = arith.constant 1.000000e+00 : f32
    %398 = vector.broadcast %cst_147 : f32 to vector<8x1xf32>
    %399 = arith.addf %398, %397 : vector<8x1xf32>
    %cst_148 = arith.constant 5.000000e-01 : f32
    %400 = vector.broadcast %cst_148 : f32 to vector<8x1xf32>
    %401 = arith.mulf %400, %399 : vector<8x1xf32>
    %cst_149 = arith.constant 9.99999993E-9 : f32
    %402 = vector.broadcast %cst_149 : f32 to vector<8x1xf32>
    %403 = arith.addf %401, %402 : vector<8x1xf32>
    %404 = math.log %403 : vector<8x1xf32>
    %cst_150 = arith.constant 0.000000e+00 : f32
    %405 = vector.broadcast %cst_150 : f32 to vector<8x1xf32>
    %406 = arith.subf %405, %404 : vector<8x1xf32>
    %c0_151 = arith.constant 0 : index
    %c0_152 = arith.constant 0 : index
    %407 = vector.load %arg3[%c0_151, %c0_152] : memref<8x1xf32, #tpu.memory_space<vmem>>, vector<8x1xf32>
    tpu.vector_store %arg3[%c0_151, %c0_152], %406 {strides = array<i32>} : memref<8x1xf32, #tpu.memory_space<vmem>>, vector<8x1xf32>,
    return
  }
  func.func @transform_0(%arg0: i32) -> (i32, i32) {
    %c0_i32 = arith.constant 0 : i32
    %c0_i32_0 = arith.constant 0 : i32
    return %arg0, %c0_i32 : i32, i32
  }
  func.func @transform_1(%arg0: i32) -> (i32, i32) {
    %c0_i32 = arith.constant 0 : i32
    %c0_i32_0 = arith.constant 0 : i32
    return %arg0, %c0_i32 : i32, i32
  }
  func.func @transform_2(%arg0: i32) -> (i32, i32) {
    %c0_i32 = arith.constant 0 : i32
    %c0_i32_0 = arith.constant 0 : i32
    return %arg0, %c0_i32 : i32, i32
  }
}

</mosaic_0001>

<bundles_post_ra>
// kernel: tpu_custom_call.1
= control target key start
LH: loop header
LB: loop body
LE: loop exit
PB: predicated region body
PF: predicated region fallthrough
CT: control target
= control target key end

     0   :  { %vm282_vm15 = vcmask 7168   ;;  %s416_s0 = inlined_call_operand.vmem [shape: f32[8,128], index: 0, kind: input, shape index: {}]   ;;  %s417_s1 = inlined_call_operand.vmem [shape: s32[8,1], index: 1, kind: input, shape index: {}]   ;;  %s418_s2 = inlined_call_operand.vmem [shape: f32[8,1], index: 2, kind: output, shape index: {}]  }
   0x1   :  { %v11_v0 = vld [vmem:[%s416_s0] sm:$0xff] }
   0x2   :  { %v15_v1 = vmul.f32 %v11_v0, %v11_v0 }
   0x4   :  { %16 = vadd.xlane.f32.xlu0 %v15_v1 }
  0x91   :  { %v17_v2 = vpop.xlane.xlu0 %16 }
  0x92   :  { %308 = vrsqrt.f32 %v17_v2  ;;  %vm20_vm0 = vcmp.eq.f32.partialorder %v17_v2, inf  ;;  %v23_v5 = vand.u32 2147483648, %v17_v2  ;;  %vm22_vm1 = vcmp.eq.f32.partialorder %v17_v2, 0.0 }
  0x9c   :  { %v309_v3 = vpop.eup %308 }
  0x9d   :  { %v19_v4 = vmul.f32 %v309_v3, %v17_v2 }
  0x9f   :  { %v21_v6 = vsel %vm20_vm0, %v17_v2, %v19_v4 }
  0xa0   :  { %v24_v7 = vsel %vm22_vm1, %v23_v5, %v21_v6 }
  0xa1   :  { %v25_v8 = vmax.f32 %v24_v7, 1e-12 }
  0xa3   :  { %310 = vrcp.f32 %v25_v8 }
  0xad   :  { %v311_v9 = vpop.eup %310 }
  0xae   :  { %v375_v10 = vmul.f32 %v311_v9, %v11_v0 }
  0xb0   :  { %30 = vmin.xlane.f32.xlu1 %v375_v10  ;;  %28 = vmax.xlane.f32.xlu0 %v375_v10 }
 0x13d   :  { %v31_v11 = vpop.xlane.xlu1 %30  ;;  %v29_v12 = vpop.xlane.xlu0 %28 }
 0x13e   :  { %v41_v13 = vsub.f32 0.0, %v31_v11  ;;  %v39_v14 = vsub.f32 0.0, %v29_v12 }
 0x140   :  { %v42_v15 = vadd.f32 20.0, %v41_v13  ;;  %v288_v16 = vadd.f32 -20.0, %v39_v14 }
 0x142   :  { %v43_v17 = vadd.f32 %v288_v16, %v42_v15 }
 0x144   :  { %v44_v18 = vmul.f32 0.5, %v43_v17 }
 0x146   :  { %v45_v19 = vadd.f32 %v44_v18, %v375_v10 }
 0x148   :  { %v46_v20 = vmul.f32 0.5, %v45_v19 }
 0x14a   :  { %312 = vtanh.f32 %v46_v20 }
 0x154   :  { %v313_v21 = vpop.eup %312 }
 0x155   :  { %v48_v22 = vadd.f32 1.0, %v313_v21 }
 0x157   :  { %v49_v23 = vmul.f32 0.5, %v48_v22 }
 0x159   :  { %50 = vadd.xlane.f32.xlu1 %v49_v23 }
 0x1e6   :  { %v51_v24 = vpop.xlane.xlu1 %50 }
 0x1e7   :  { %v289_v25 = vadd.f32 -5.0, %v51_v24 }
 0x1e9   :  { %vm53_vm2 = vcmp.lt.f32.partialorder %v289_v25, 0.0 }
 0x1ea   :  { %v54_v26 = vsel %vm53_vm2, %v44_v18, %v288_v16  ;;  %v55_v27 = vsel %vm53_vm2, %v42_v15, %v44_v18 }
 0x1eb   :  { %v56_v28 = vadd.f32 %v55_v27, %v54_v26 }
 0x1ed   :  { %v57_v29 = vmul.f32 0.5, %v56_v28 }
 0x1ef   :  { %v58_v30 = vadd.f32 %v57_v29, %v375_v10 }
 0x1f1   :  { %v59_v31 = vmul.f32 0.5, %v58_v30 }
 0x1f3   :  { %314 = vtanh.f32 %v59_v31 }
 0x1fd   :  { %v315_v32 = vpop.eup %314 }
 0x1fe   :  { %v61_v33 = vadd.f32 1.0, %v315_v32 }
 0x200   :  { %v62_v34 = vmul.f32 0.5, %v61_v33 }
 0x202   :  { %63 = vadd.xlane.f32.xlu0 %v62_v34 }
 0x28f   :  { %v64_v35 = vpop.xlane.xlu0 %63 }
 0x290   :  { %v290_v36 = vadd.f32 -5.0, %v64_v35 }
 0x292   :  { %vm66_vm3 = vcmp.lt.f32.partialorder %v290_v36, 0.0 }
 0x293   :  { %v67_v37 = vsel %vm66_vm3, %v57_v29, %v54_v26  ;;  %v68_v38 = vsel %vm66_vm3, %v55_v27, %v57_v29 }
 0x294   :  { %v69_v39 = vadd.f32 %v68_v38, %v67_v37 }
 0x296   :  { %v70_v40 = vmul.f32 0.5, %v69_v39 }
 0x298   :  { %v71_v41 = vadd.f32 %v70_v40, %v375_v10 }
 0x29a   :  { %v72_v42 = vmul.f32 0.5, %v71_v41 }
 0x29c   :  { %316 = vtanh.f32 %v72_v42 }
 0x2a6   :  { %v317_v43 = vpop.eup %316 }
 0x2a7   :  { %v74_v44 = vadd.f32 1.0, %v317_v43 }
 0x2a9   :  { %v75_v45 = vmul.f32 0.5, %v74_v44 }
 0x2ab   :  { %76 = vadd.xlane.f32.xlu1 %v75_v45 }
 0x338   :  { %v77_v46 = vpop.xlane.xlu1 %76 }
 0x339   :  { %v291_v47 = vadd.f32 -5.0, %v77_v46 }
 0x33b   :  { %vm79_vm4 = vcmp.lt.f32.partialorder %v291_v47, 0.0 }
 0x33c   :  { %v80_v48 = vsel %vm79_vm4, %v70_v40, %v67_v37  ;;  %v81_v49 = vsel %vm79_vm4, %v68_v38, %v70_v40 }
 0x33d   :  { %v82_v50 = vadd.f32 %v81_v49, %v80_v48 }
 0x33f   :  { %v83_v51 = vmul.f32 0.5, %v82_v50 }
 0x341   :  { %v84_v52 = vadd.f32 %v83_v51, %v375_v10 }
 0x343   :  { %v85_v53 = vmul.f32 0.5, %v84_v52 }
 0x345   :  { %318 = vtanh.f32 %v85_v53 }
 0x34f   :  { %v319_v54 = vpop.eup %318 }
 0x350   :  { %v87_v55 = vadd.f32 1.0, %v319_v54 }
 0x352   :  { %v88_v56 = vmul.f32 0.5, %v87_v55 }
 0x354   :  { %89 = vadd.xlane.f32.xlu0 %v88_v56 }
 0x3e1   :  { %v90_v57 = vpop.xlane.xlu0 %89 }
 0x3e2   :  { %v292_v58 = vadd.f32 -5.0, %v90_v57 }
 0x3e4   :  { %vm92_vm5 = vcmp.lt.f32.partialorder %v292_v58, 0.0 }
 0x3e5   :  { %v93_v59 = vsel %vm92_vm5, %v83_v51, %v80_v48  ;;  %v94_v60 = vsel %vm92_vm5, %v81_v49, %v83_v51 }
 0x3e6   :  { %v95_v61 = vadd.f32 %v94_v60, %v93_v59 }
 0x3e8   :  { %v96_v62 = vmul.f32 0.5, %v95_v61 }
 0x3ea   :  { %v97_v63 = vadd.f32 %v96_v62, %v375_v10 }
 0x3ec   :  { %v98_v0 = vmul.f32 0.5, %v97_v63 }
 0x3ee   :  { %320 = vtanh.f32 %v98_v0 }
 0x3f8   :  { %v321_v1 = vpop.eup %320 }
 0x3f9   :  { %v100_v2 = vadd.f32 1.0, %v321_v1 }
 0x3fb   :  { %v101_v3 = vmul.f32 0.5, %v100_v2 }
 0x3fd   :  { %102 = vadd.xlane.f32.xlu1 %v101_v3 }
 0x48a   :  { %v103_v4 = vpop.xlane.xlu1 %102 }
 0x48b   :  { %v293_v5 = vadd.f32 -5.0, %v103_v4 }
 0x48d   :  { %vm105_vm6 = vcmp.lt.f32.partialorder %v293_v5, 0.0 }
 0x48e   :  { %v106_v6 = vsel %vm105_vm6, %v96_v62, %v93_v59  ;;  %v107_v7 = vsel %vm105_vm6, %v94_v60, %v96_v62 }
 0x48f   :  { %v108_v8 = vadd.f32 %v107_v7, %v106_v6 }
 0x491   :  { %v109_v9 = vmul.f32 0.5, %v108_v8 }
 0x493   :  { %v110_v11 = vadd.f32 %v109_v9, %v375_v10 }
 0x495   :  { %v111_v12 = vmul.f32 0.5, %v110_v11 }
 0x497   :  { %322 = vtanh.f32 %v111_v12 }
 0x4a1   :  { %v323_v13 = vpop.eup %322 }
 0x4a2   :  { %v113_v14 = vadd.f32 1.0, %v323_v13 }
 0x4a4   :  { %v114_v15 = vmul.f32 0.5, %v113_v14 }
 0x4a6   :  { %115 = vadd.xlane.f32.xlu0 %v114_v15 }
 0x533   :  { %v116_v16 = vpop.xlane.xlu0 %115 }
 0x534   :  { %v294_v17 = vadd.f32 -5.0, %v116_v16 }
 0x536   :  { %vm118_vm7 = vcmp.lt.f32.partialorder %v294_v17, 0.0 }
 0x537   :  { %v119_v18 = vsel %vm118_vm7, %v109_v9, %v106_v6  ;;  %v120_v19 = vsel %vm118_vm7, %v107_v7, %v109_v9 }
 0x538   :  { %v121_v20 = vadd.f32 %v120_v19, %v119_v18 }
 0x53a   :  { %v122_v21 = vmul.f32 0.5, %v121_v20 }
 0x53c   :  { %v123_v22 = vadd.f32 %v122_v21, %v375_v10 }
 0x53e   :  { %v124_v23 = vmul.f32 0.5, %v123_v22 }
 0x540   :  { %324 = vtanh.f32 %v124_v23 }
 0x54a   :  { %v325_v24 = vpop.eup %324 }
 0x54b   :  { %v126_v25 = vadd.f32 1.0, %v325_v24 }
 0x54d   :  { %v127_v26 = vmul.f32 0.5, %v126_v25 }
 0x54f   :  { %128 = vadd.xlane.f32.xlu1 %v127_v26 }
 0x5dc   :  { %v129_v27 = vpop.xlane.xlu1 %128 }
 0x5dd   :  { %v295_v28 = vadd.f32 -5.0, %v129_v27 }
 0x5df   :  { %vm131_vm8 = vcmp.lt.f32.partialorder %v295_v28, 0.0 }
 0x5e0   :  { %v132_v29 = vsel %vm131_vm8, %v122_v21, %v119_v18  ;;  %v133_v30 = vsel %vm131_vm8, %v120_v19, %v122_v21 }
 0x5e1   :  { %v134_v31 = vadd.f32 %v133_v30, %v132_v29 }
 0x5e3   :  { %v135_v32 = vmul.f32 0.5, %v134_v31 }
 0x5e5   :  { %v136_v33 = vadd.f32 %v135_v32, %v375_v10 }
 0x5e7   :  { %v137_v34 = vmul.f32 0.5, %v136_v33 }
 0x5e9   :  { %326 = vtanh.f32 %v137_v34 }
 0x5f3   :  { %v327_v35 = vpop.eup %326 }
 0x5f4   :  { %v139_v36 = vadd.f32 1.0, %v327_v35 }
 0x5f6   :  { %v140_v37 = vmul.f32 0.5, %v139_v36 }
 0x5f8   :  { %141 = vadd.xlane.f32.xlu0 %v140_v37 }
 0x685   :  { %v142_v38 = vpop.xlane.xlu0 %141 }
 0x686   :  { %v296_v39 = vadd.f32 -5.0, %v142_v38 }
 0x688   :  { %vm144_vm9 = vcmp.lt.f32.partialorder %v296_v39, 0.0 }
 0x689   :  { %v145_v40 = vsel %vm144_vm9, %v135_v32, %v132_v29  ;;  %v146_v41 = vsel %vm144_vm9, %v133_v30, %v135_v32 }
 0x68a   :  { %v147_v42 = vadd.f32 %v146_v41, %v145_v40 }
 0x68c   :  { %v148_v43 = vmul.f32 0.5, %v147_v42 }
 0x68e   :  { %v149_v44 = vadd.f32 %v148_v43, %v375_v10 }
 0x690   :  { %v150_v45 = vmul.f32 0.5, %v149_v44 }
 0x692   :  { %328 = vtanh.f32 %v150_v45 }
 0x69c   :  { %v329_v46 = vpop.eup %328 }
 0x69d   :  { %v152_v47 = vadd.f32 1.0, %v329_v46 }
 0x69f   :  { %v153_v48 = vmul.f32 0.5, %v152_v47 }
 0x6a1   :  { %154 = vadd.xlane.f32.xlu1 %v153_v48  ;;  %v356_v48 = vmov 0  }
 0x6a2   :  { %306 = vset.pattern.permute.xlu1 %v356_v48  ;;  %307 = vset.pattern.permute.xlu0 %v356_v48 }
 0x72e   :  { %v155_v49 = vpop.xlane.xlu1 %154 }
 0x72f   :  { %v297_v50 = vadd.f32 -5.0, %v155_v49 }
 0x731   :  { %vm157_vm10 = vcmp.lt.f32.partialorder %v297_v50, 0.0 }
 0x732   :  { %v158_v51 = vsel %vm157_vm10, %v148_v43, %v145_v40  ;;  %v159_v52 = vsel %vm157_vm10, %v146_v41, %v148_v43 }
 0x733   :  { %v160_v53 = vadd.f32 %v159_v52, %v158_v51 }
 0x735   :  { %v161_v54 = vmul.f32 0.5, %v160_v53 }
 0x737   :  { %v162_v55 = vadd.f32 %v161_v54, %v375_v10 }
 0x739   :  { %v163_v56 = vmul.f32 0.5, %v162_v55 }
 0x73b   :  { %330 = vtanh.f32 %v163_v56 }
 0x745   :  { %v331_v57 = vpop.eup %330 }
 0x746   :  { %v165_v58 = vadd.f32 1.0, %v331_v57 }
 0x748   :  { %v166_v59 = vmul.f32 0.5, %v165_v58 }
 0x74a   :  { %167 = vadd.xlane.f32.xlu0 %v166_v59 }
 0x7d7   :  { %v168_v60 = vpop.xlane.xlu0 %167 }
 0x7d8   :  { %v298_v61 = vadd.f32 -5.0, %v168_v60 }
 0x7da   :  { %vm170_vm11 = vcmp.lt.f32.partialorder %v298_v61, 0.0 }
 0x7db   :  { %v171_v62 = vsel %vm170_vm11, %v161_v54, %v158_v51  ;;  %v172_v63 = vsel %vm170_vm11, %v159_v52, %v161_v54 }
 0x7dc   :  { %v173_v0 = vadd.f32 %v172_v63, %v171_v62 }
 0x7de   :  { %v174_v1 = vmul.f32 0.5, %v173_v0 }
 0x7e0   :  { %v175_v2 = vadd.f32 %v174_v1, %v375_v10 }
 0x7e2   :  { %v176_v3 = vmul.f32 0.5, %v175_v2 }
 0x7e4   :  { %332 = vtanh.f32 %v176_v3 }
 0x7ee   :  { %v333_v4 = vpop.eup %332 }
 0x7ef   :  { %v178_v5 = vadd.f32 1.0, %v333_v4 }
 0x7f1   :  { %v179_v6 = vmul.f32 0.5, %v178_v5 }
 0x7f3   :  { %180 = vadd.xlane.f32.xlu1 %v179_v6 }
 0x880   :  { %v181_v7 = vpop.xlane.xlu1 %180 }
 0x881   :  { %v299_v8 = vadd.f32 -5.0, %v181_v7 }
 0x883   :  { %vm183_vm12 = vcmp.lt.f32.partialorder %v299_v8, 0.0 }
 0x884   :  { %v184_v9 = vsel %vm183_vm12, %v174_v1, %v171_v62  ;;  %v185_v11 = vsel %vm183_vm12, %v172_v63, %v174_v1  ;;  %v12_v1 = vld [vmem:[%s417_s1] sm:$0xff] }
 0x885   :  { %v186_v12 = vadd.f32 %v185_v11, %v184_v9 }
 0x887   :  { %v187_v13 = vmul.f32 0.5, %v186_v12 }
 0x889   :  { %v188_v14 = vadd.f32 %v187_v13, %v375_v10 }
 0x88b   :  { %v189_v15 = vmul.f32 0.5, %v188_v14 }
 0x88d   :  { %334 = vtanh.f32 %v189_v15 }
 0x897   :  { %v335_v16 = vpop.eup %334 }
 0x898   :  { %v191_v17 = vadd.f32 1.0, %v335_v16 }
 0x89a   :  { %v192_v18 = vmul.f32 0.5, %v191_v17  ;;  %v13_v17 = vlaneseq }
 0x89c   :  { %193 = vadd.xlane.f32.xlu0 %v192_v18 }
 0x929   :  { %v194_v19 = vpop.xlane.xlu0 %193 }
 0x92a   :  { %v300_v20 = vadd.f32 -5.0, %v194_v19 }
 0x92c   :  { %vm196_vm13 = vcmp.lt.f32.partialorder %v300_v20, 0.0  ;;  %v14_v20 = vand.u32 127, %v13_v17 }
 0x92d   :  { %v391_v21 = vsel %vm196_vm13, %v187_v13, %v184_v9  ;;  %v393_v22 = vsel %vm196_vm13, %v185_v11, %v187_v13 }
 0x92e   :  { %v199_v23 = vadd.f32 %v393_v22, %v391_v21 }
 0x930   :  { %v200_v24 = vmul.f32 0.5, %v199_v23 }
 0x932   :  { %v201_v25 = vadd.f32 %v200_v24, %v375_v10 }
 0x934   :  { %v202_v26 = vmul.f32 0.5, %v201_v25 }
 0x936   :  { %336 = vtanh.f32 %v202_v26 }
 0x940   :  { %v337_v27 = vpop.eup %336 }
 0x941   :  { %v204_v28 = vadd.f32 1.0, %v337_v27 }
 0x943   :  { %v205_v29 = vmul.f32 0.5, %v204_v28 }
 0x945   :  { %206 = vadd.xlane.f32.xlu0 %v205_v29  ;;  %v209_v30 = vsub.f32 1.0, %v205_v29 }
 0x947   :  { %v210_v31 = vmul.f32 %v209_v30, %v205_v29 }
 0x949   :  { %211 = vadd.xlane.f32.xlu1 %v210_v31 }
 0x9d2   :  { %v207_v34 = vpop.xlane.xlu0 %206 }
 0x9d3   :  { %v301_v35 = vadd.f32 -5.0, %v207_v34 }
 0x9d6   :  { %v212_v32 = vpop.xlane.xlu1 %211 }
 0x9d7   :  { %v213_v33 = vmax.f32 %v212_v32, 1e-12 }
 0x9d9   :  { %338 = vrcp.f32 %v213_v33 }
 0x9e3   :  { %v339_v36 = vpop.eup %338 }
 0x9e4   :  { %v215_v37 = vmul.f32 %v339_v36, %v301_v35 }
 0x9e6   :  { %v216_v38 = vsub.f32 %v200_v24, %v215_v37 }
 0x9e8   :  { %v217_v39 = vmax.f32 %v391_v21, %v216_v38 }
 0x9ea   :  { %v218_v40 = vmin.f32 %v393_v22, %v217_v39 }
 0x9ec   :  { %v219_v41 = vadd.f32 %v218_v40, %v375_v10 }
 0x9ee   :  { %v220_v42 = vmul.f32 0.5, %v219_v41 }
 0x9f0   :  { %340 = vtanh.f32 %v220_v42 }
 0x9fa   :  { %v341_v43 = vpop.eup %340 }
 0x9fb   :  { %v222_v44 = vadd.f32 1.0, %v341_v43 }
 0x9fd   :  { %v223_v45 = vmul.f32 0.5, %v222_v44 }
 0x9ff   :  { %224 = vadd.xlane.f32.xlu0 %v223_v45  ;;  %v227_v46 = vsub.f32 1.0, %v223_v45 }
 0xa01   :  { %v228_v47 = vmul.f32 %v227_v46, %v223_v45 }
 0xa03   :  { %229 = vadd.xlane.f32.xlu1 %v228_v47 }
 0xa8c   :  { %v225_v51 = vpop.xlane.xlu0 %224 }
 0xa8d   :  { %v302_v52 = vadd.f32 -5.0, %v225_v51 }
 0xa90   :  { %v230_v49 = vpop.xlane.xlu1 %229 }
 0xa91   :  { %v231_v50 = vmax.f32 %v230_v49, 1e-12 }
 0xa93   :  { %342 = vrcp.f32 %v231_v50 }
 0xa9d   :  { %v343_v53 = vpop.eup %342 }
 0xa9e   :  { %v233_v54 = vmul.f32 %v343_v53, %v302_v52 }
 0xaa0   :  { %v234_v55 = vsub.f32 %v218_v40, %v233_v54 }
 0xaa2   :  { %v235_v56 = vmax.f32 %v391_v21, %v234_v55 }
 0xaa4   :  { %v236_v57 = vmin.f32 %v393_v22, %v235_v56 }
 0xaa6   :  { %v237_v58 = vadd.f32 %v236_v57, %v375_v10 }
 0xaa8   :  { %v238_v59 = vmul.f32 0.5, %v237_v58 }
 0xaaa   :  { %344 = vtanh.f32 %v238_v59 }
 0xab4   :  { %v345_v60 = vpop.eup %344 }
 0xab5   :  { %v240_v61 = vadd.f32 1.0, %v345_v60 }
 0xab7   :  { %v241_v62 = vmul.f32 0.5, %v240_v61 }
 0xab9   :  { %242 = vadd.xlane.f32.xlu0 %v241_v62  ;;  %v245_v63 = vsub.f32 1.0, %v241_v62 }
 0xabb   :  { %v246_v0 = vmul.f32 %v245_v63, %v241_v62 }
 0xabd   :  { %247 = vadd.xlane.f32.xlu1 %v246_v0 }
 0xace   :  { %33 = vperm.xlu1 %306, %v12_v1  }
 0xb46   :  { %v243_v4 = vpop.xlane.xlu0 %242 }
 0xb47   :  { %v303_v5 = vadd.f32 -5.0, %v243_v4 }
 0xb4a   :  { %v248_v2 = vpop.xlane.xlu1 %247 }
 0xb4b   :  { %v249_v3 = vmax.f32 %v248_v2, 1e-12 }
 0xb4d   :  { %346 = vrcp.f32 %v249_v3 }
 0xb4e   :  { %v34_v23 = vpop.permute.xlu1 %33 }
 0xb4f   :  { %vm35_vm14 = vcmp.eq.s32.totalorder %v14_v20, %v34_v23 }
 0xb50   :  { %v36_v24 = vsel %vm35_vm14, %v375_v10, 0.0 }
 0xb57   :  { %v347_v6 = vpop.eup %346 }
 0xb58   :  { %v251_v7 = vmul.f32 %v347_v6, %v303_v5 }
 0xb5a   :  { %v252_v8 = vsub.f32 %v236_v57, %v251_v7 }
 0xb5c   :  { %v253_v9 = vmax.f32 %v391_v21, %v252_v8 }
 0xb5e   :  { %v254_v11 = vmin.f32 %v393_v22, %v253_v9 }
 0xb60   :  { %v255_v12 = vadd.f32 %v254_v11, %v375_v10 }
 0xb62   :  { %v256_v13 = vmul.f32 0.5, %v255_v12 }
 0xb64   :  { %348 = vtanh.f32 %v256_v13 }
 0xb6e   :  { %v349_v14 = vpop.eup %348 }
 0xb6f   :  { %v258_v15 = vadd.f32 1.0, %v349_v14 }
 0xb71   :  { %v259_v16 = vmul.f32 0.5, %v258_v15 }
 0xb73   :  { %v263_v18 = vsub.f32 1.0, %v259_v16 }
 0xb75   :  { %v264_v19 = vmul.f32 %v263_v18, %v259_v16 }
 0xb77   :  { %265 = vadd.xlane.f32.xlu0 %v264_v19 }
 0xb7b   :  { %260 = vadd.xlane.f32.xlu0 %v259_v16 }
 0xb7f   :  { %37 = vadd.xlane.f32.xlu0 %v36_v24 }
 0xc04   :  { %v266_v25 = vpop.xlane.xlu0 %265 }
 0xc05   :  { %v267_v26 = vmax.f32 %v266_v25, 1e-12 }
 0xc07   :  { %350 = vrcp.f32 %v267_v26 }
 0xc08   :  { %v261_v27 = vpop.xlane.xlu0 %260 }
 0xc09   :  { %v304_v28 = vadd.f32 -5.0, %v261_v27 }
 0xc0c   :  { %v38_v34 = vpop.xlane.xlu0 %37 }
 0xc11   :  { %v351_v29 = vpop.eup %350 }
 0xc12   :  { %v269_v30 = vmul.f32 %v351_v29, %v304_v28 }
 0xc14   :  { %v270_v31 = vsub.f32 %v254_v11, %v269_v30 }
 0xc16   :  { %v271_v32 = vmax.f32 %v391_v21, %v270_v31 }
 0xc18   :  { %v272_v33 = vmin.f32 %v393_v22, %v271_v32 }
 0xc1a   :  { %v273_v35 = vadd.f32 %v272_v33, %v38_v34 }
 0xc1c   :  { %v274_v36 = vmul.f32 0.5, %v273_v35 }
 0xc1e   :  { %352 = vtanh.f32 %v274_v36 }
 0xc28   :  { %v353_v37 = vpop.eup %352 }
 0xc29   :  { %v276_v38 = vadd.f32 1.0, %v353_v37 }
 0xc2b   :  { %v277_v10 = vmul.f32 0.5, %v276_v38 }
 0xc2d   :  { %v278_v39 = vadd.f32 1e-08, %v277_v10 }
 0xc2f   :  { %354 = vlog2.f32 %v278_v39 }
 0xc39   :  { %v355_v40 = vpop.eup %354 }
 0xc3a   :  { %v280_v41 = vmul.f32 0.6931472, %v355_v40 }
 0xc3c   :  { %v281_v42 = vsub.f32 0.0, %v280_v41 }
 0xc3e   :  { %283 = vst.msk [vmem:[%s418_s2] sm:$0xff] %vm282_vm15, %v281_v42 }

</bundles_post_ra>
